<compile_context>
chip_gen: v7x
topology: tpu7x:2x2x1
jax: 0.10.0
libtpu: 0.0.40
codegen_flags: <defaults>
</compile_context>

<pallas_src>
import functools

import jax
import jax.numpy as jnp
from jax import lax
from jax.experimental import pallas as pl
from jax.experimental.pallas import tpu as pltpu


def _tpu_defaults():
    """Generation-aware block-size / VMEM-limit / core-count defaults."""
    kind = ""
    try:
        kind = jax.devices()[0].device_kind.lower()
    except Exception:
        pass
    if "v7" in kind:
        # v7x: 64 MiB VMEM per TC, 2 TCs/chip, ~3.2 TB/s HBM -> bigger blocks,
        # tighter VMEM cap, split token stream across both cores.
        return {"vmem_limit": 48 << 20, "block_bytes": 6 << 20, "cores": 2}
    if ("v4" in kind) or ("v5p" in kind):
        # Megacore parts: 2 TCs/chip, 128 MiB VMEM.
        return {"vmem_limit": 96 << 20, "block_bytes": 4 << 20, "cores": 2}
    if "tpu" in kind:
        # v5e / v6e: 1 TC/chip, 128 MiB VMEM.
        return {"vmem_limit": 96 << 20, "block_bytes": 4 << 20, "cores": 1}
    # Unknown backend: conservative.
    return {"vmem_limit": 64 << 20, "block_bytes": 2 << 20, "cores": 1}


def _pool_sum_kernel(starts_ref, lens_ref, x_ref, psum_ref, *,
                     total_tokens, tok_block, nblk_total, blocks_per_split):
    """One grid step == one block of `tok_block` tokens of one token split.

    starts_ref : VMEM int32 (B, 1)       per-sequence start offset (flat stream)
    lens_ref   : VMEM int32 (B, 1)       per-sequence prompt length
    x_ref      : VMEM (tok_block, H)     current token block (native dtype)
    psum_ref   : VMEM f32 (1, B, H)      this split's masked token sums (output,
                                         resident across the reduction axis)
    """
    s = pl.program_id(0)                       # token-split index ("parallel")
    i = pl.program_id(1)                       # block within split ("arbitrary")
    B = starts_ref.shape[0]
    gblk = s * blocks_per_split + i            # global token-block index

    @pl.when(i == 0)
    def _init():
        psum_ref[...] = jnp.zeros_like(psum_ref)

    starts = starts_ref[...]                   # (B, 1)
    ends = starts + lens_ref[...]              # (B, 1)

    def accumulate(x_blk):
        # own[b, t] = 1 iff global token (gblk*tok_block + t) belongs to seq b.
        tok = gblk * tok_block + lax.broadcasted_iota(jnp.int32, (B, tok_block), 1)
        own = ((tok >= starts) & (tok < ends)).astype(x_blk.dtype)
        psum_ref[0] = psum_ref[0] + jnp.dot(
            own, x_blk, preferred_element_type=jnp.float32)

    if total_tokens % tok_block:
        # Steady-state path: no tail mask (the single largest per-step VPU
        # cost in an otherwise DMA-bound loop is avoided on every block but
        # the last one).
        @pl.when(gblk < nblk_total - 1)
        def _steady():
            accumulate(x_ref[...])

        # Final (partial) block: zero the out-of-range rows so stale VMEM
        # garbage (possibly NaN) cannot poison the 0-weighted MXU terms.
        # Blocks with gblk >= nblk_total (index-map-clamped overhang of the
        # last split) fall through both branches and contribute nothing.
        @pl.when(gblk == nblk_total - 1)
        def _tail():
            xb = x_ref[...]
            row = (nblk_total - 1) * tok_block + lax.broadcasted_iota(
                jnp.int32, (tok_block, 1), 0)
            accumulate(jnp.where(row < total_tokens, xb, jnp.zeros_like(xb)))
    else:
        @pl.when(gblk < nblk_total)
        def _steady():
            accumulate(x_ref[...])


def _classify_kernel(psum_ref, lens_ref, w_ref, b_ref, out_ref):
    """Tiny epilogue: combine splits -> mean -> classifier -> softmax.

    psum_ref : VMEM f32 (num_splits, B, H)
    lens_ref : VMEM int32 (B, 1)
    w_ref    : VMEM (H, C)   classifier weight (transposed torch layout)
    b_ref    : VMEM (1, C)   classifier bias
    out_ref  : VMEM (B, C)   class probabilities
    """
    pooled = jnp.sum(psum_ref[...], axis=0)                       # (B, H) f32
    lens_f = jnp.maximum(lens_ref[...], 1).astype(jnp.float32)    # (B, 1)
    pooled = pooled / lens_f                                      # mean pool
    # Classifier matmul in the weight's native dtype (no f32 copy of W);
    # MXU accumulates in f32.
    logits = jnp.dot(pooled.astype(w_ref.dtype), w_ref[...],
                     preferred_element_type=jnp.float32)
    logits = logits + b_ref[...].astype(jnp.float32)              # (B, C)
    m = jnp.max(logits, axis=-1, keepdims=True)
    e = jnp.exp(logits - m)
    out_ref[...] = (e / jnp.sum(e, axis=-1, keepdims=True)).astype(out_ref.dtype)


def classifier_pooler(hidden_states_flat, prompt_lens, weight, bias, *,
                      target_block_bytes=None, num_token_splits=None,
                      vmem_limit_bytes=None):
    """hidden_states_flat: [T, H]; prompt_lens: int array/list [B];
    weight: [H, C] (torch Linear weight transposed); bias: [C].
    Returns softmax scores [B, C] (float32)."""
    T, H = hidden_states_flat.shape
    C = weight.shape[-1]

    # Best-effort wrapper-side check (only when lengths are host-concrete, so
    # device-array prompt_lens never forces a sync / retrace).
    if isinstance(prompt_lens, (list, tuple)):
        assert sum(int(l) for l in prompt_lens) == T, \
            "sum(prompt_lens) must equal the number of flat tokens"

    prompt_lens = jnp.asarray(prompt_lens, dtype=jnp.int32)
    B = prompt_lens.shape[0]

    # Per-sequence start offsets in the flat stream (device-side; a new length
    # pattern does NOT retrace, and there is no padded [B, S, H] copy).
    starts = jnp.concatenate(
        [jnp.zeros((1,), jnp.int32),
         jnp.cumsum(prompt_lens)[:-1].astype(jnp.int32)]).reshape(B, 1)
    lens = prompt_lens.reshape(B, 1)

    defaults = _tpu_defaults()
    block_bytes = int(target_block_bytes or defaults["block_bytes"])
    vmem_limit = int(vmem_limit_bytes or defaults["vmem_limit"])
    splits_req = int(num_token_splits or defaults["cores"])

    # --- token-block size: sized by BYTES, rounded to dtype sublane packing --
    itemsize = jnp.dtype(hidden_states_flat.dtype).itemsize
    sublane = max(8, 32 // itemsize)          # 8 f32, 16 bf16, 32 int8/fp8
    t_pad = -(-T // sublane) * sublane
    tok_block = (block_bytes // (H * itemsize) // sublane) * sublane
    tok_block = max(sublane, min(tok_block, t_pad))

    nblk_total = (T + tok_block - 1) // tok_block
    num_splits = max(1, min(splits_req, nblk_total))
    blocks_per_split = (nblk_total + num_splits - 1) // num_splits

    kernel = functools.partial(
        _pool_sum_kernel, total_tokens=T, tok_block=tok_block,
        nblk_total=nblk_total, blocks_per_split=blocks_per_split)

    def x_map(s, i):
        # Clamp the overhanging blocks of the last split so no OOB DMA is
        # issued; the kernel skips their contribution.
        return (jnp.minimum(s * blocks_per_split + i, nblk_total - 1), 0)

    # ---- kernel 1: streaming masked per-sequence token sums ----------------
    psums = pl.pallas_call(
        kernel,
        out_shape=jax.ShapeDtypeStruct((num_splits, B, H), jnp.float32),
        grid_spec=pltpu.PrefetchScalarGridSpec(
            num_scalar_prefetch=0,
            grid=(num_splits, blocks_per_split),
            in_specs=[
                pl.BlockSpec((B, 1), lambda s, i: (0, 0)),          # starts
                pl.BlockSpec((B, 1), lambda s, i: (0, 0)),          # lens
                pl.BlockSpec((tok_block, H), x_map),                # token block
            ],
            out_specs=pl.BlockSpec((1, B, H), lambda s, i: (s, 0, 0)),
        ),
        compiler_params=pltpu.CompilerParams(
            # token-block axis is a reduction into the resident output block;
            # the split axis maps to TensorCores on multi-core parts.
            dimension_semantics=("parallel", "arbitrary"),
            vmem_limit_bytes=vmem_limit),
    )(starts, lens, hidden_states_flat)

    # ---- kernel 2: combine + mean + classifier + softmax (tiny) ------------
    scores = pl.pallas_call(
        _classify_kernel,
        out_shape=jax.ShapeDtypeStruct((B, C), jnp.float32),
        grid=(1,),
        in_specs=[
            pl.BlockSpec((num_splits, B, H), lambda i: (0, 0, 0)),
            pl.BlockSpec((B, 1), lambda i: (0, 0)),
            pl.BlockSpec((H, C), lambda i: (0, 0)),
            pl.BlockSpec((1, C), lambda i: (0, 0)),
        ],
        out_specs=pl.BlockSpec((B, C), lambda i: (0, 0)),
    )(psums, lens, weight, bias.reshape(1, C))

    return scores


def _reference(hidden_states_flat, prompt_lens, weight, bias):
    """Pure-JAX reference mirroring the PyTorch forward."""
    outs = []
    offset = 0
    for L in prompt_lens:
        seq = hidden_states_flat[offset:offset + L]
        offset += L
        pooled = jnp.mean(seq.astype(jnp.float32), axis=0)                # pooler
        logits = pooled @ weight.astype(jnp.float32) + bias.astype(jnp.float32)
        outs.append(jax.nn.softmax(logits))                               # act_fn
    return jnp.stack(outs)


if __name__ == "__main__":
    key = jax.random.PRNGKey(0)
    k_x1, k_x2, k_w, k_b = jax.random.split(key, 4)

    hidden_size = 32       # H
    num_labels = 4         # C

    # torch Linear(H, C) weight laid out transposed: [H, C]
    classifier_w = jax.random.normal(k_w, (hidden_size, num_labels), jnp.float32) * 0.1
    classifier_b = jax.random.normal(k_b, (num_labels,), jnp.float32) * 0.1

    # Case 1: three requests, single (partial) token block.
    prompt_lens_1 = [5, 6, 2]
    t1 = sum(prompt_lens_1)
    x1 = jax.random.normal(k_x1, (t1, hidden_size), jnp.float32)
    s1 = jax.block_until_ready(
        classifier_pooler(x1, prompt_lens_1, classifier_w, classifier_b))
    r1 = _reference(x1, prompt_lens_1, classifier_w, classifier_b)
    assert s1.shape == (len(prompt_lens_1), num_labels)
    assert jnp.allclose(s1, r1, atol=1e-5, rtol=1e-5), (s1, r1)

    # Case 2: multi-block stream with a non-aligned tail and a 2-way token
    # split (exercises the parallel split, OOB-clamp and tail-mask paths).
    prompt_lens_2 = [7, 9, 5, 12]        # T = 33 -> 5 blocks of 8, tail of 1
    t2 = sum(prompt_lens_2)
    x2 = jax.random.normal(k_x2, (t2, hidden_size), jnp.float32)
    s2 = jax.block_until_ready(
        classifier_pooler(x2, prompt_lens_2, classifier_w, classifier_b,
                          target_block_bytes=8 * hidden_size * 4,
                          num_token_splits=2))
    r2 = _reference(x2, prompt_lens_2, classifier_w, classifier_b)
    assert s2.shape == (len(prompt_lens_2), num_labels)
    assert jnp.allclose(s2, r2, atol=1e-5, rtol=1e-5), (s2, r2)

    print("KERNEL_OK")
</pallas_src>

<mosaic_0001>
module attributes {stable_mosaic.version = 11 : i64} {
  func.func @_pool_sum_kernel(%arg0: i32, %arg1: i32, %arg2: memref<3x1xi32, #tpu.memory_space<vmem>>, %arg3: memref<3x1xi32, #tpu.memory_space<vmem>>, %arg4: memref<16x32xf32, #tpu.memory_space<vmem>>, %arg5: memref<1x3x32xf32, #tpu.memory_space<vmem>>) attributes {dimension_semantics = [#tpu.dimension_semantics<parallel>, #tpu.dimension_semantics<arbitrary>], iteration_bounds = array<i64: 1, 1>, scalar_prefetch = 0 : i64, scratch_operands = 0 : i64, tpu.core_type = #tpu.core_type<tc>, window_params = [{pipeline_mode = #tpu.pipeline_mode<synchronous>, transform_indices = @transform_0, window_bounds = array<i64: 3, 1>}, {pipeline_mode = #tpu.pipeline_mode<synchronous>, transform_indices = @transform_1, window_bounds = array<i64: 3, 1>}, {transform_indices = @transform_2, window_bounds = array<i64: 16, 32>}, {transform_indices = @transform_3, window_bounds = array<i64: 1, 3, 32>}]} {
    %c1_i32 = arith.constant 1 : i32
    %0 = arith.muli %arg0, %c1_i32 : i32
    %1 = arith.addi %0, %arg1 : i32
    %c0_i32 = arith.constant 0 : i32
    %2 = arith.cmpi eq, %arg1, %c0_i32 : i32
    %3 = arith.extui %2 : i1 to i32
    %c0_i32_0 = arith.constant 0 : i32
    %4 = arith.cmpi ne, %3, %c0_i32_0 : i32
    scf.if %4 {
      %cst = arith.constant 0.000000e+00 : f32
      %14 = vector.broadcast %cst : f32 to vector<1x3x32xf32>
      %c0_8 = arith.constant 0 : index
      %c0_9 = arith.constant 0 : index
      %c0_10 = arith.constant 0 : index
      %15 = vector.load %arg5[%c0_8, %c0_9, %c0_10] : memref<1x3x32xf32, #tpu.memory_space<vmem>>, vector<1x3x32xf32>
      tpu.vector_store %arg5[%c0_8, %c0_9, %c0_10], %14 {strides = array<i32>} : memref<1x3x32xf32, #tpu.memory_space<vmem>>, vector<1x3x32xf32>,
    } else {
    }
    %c0 = arith.constant 0 : index
    %c0_1 = arith.constant 0 : index
    %5 = vector.load %arg2[%c0, %c0_1] : memref<3x1xi32, #tpu.memory_space<vmem>>, vector<3x1xi32>
    %c0_2 = arith.constant 0 : index
    %c0_3 = arith.constant 0 : index
    %6 = vector.load %arg3[%c0_2, %c0_3] : memref<3x1xi32, #tpu.memory_space<vmem>>, vector<3x1xi32>
    %7 = arith.addi %5, %6 : vector<3x1xi32>
    %c0_i32_4 = arith.constant 0 : i32
    %8 = arith.cmpi slt, %1, %c0_i32_4 : i32
    %9 = arith.extui %8 : i1 to i32
    %c0_i32_5 = arith.constant 0 : i32
    %10 = arith.cmpi ne, %9, %c0_i32_5 : i32
    scf.if %10 {
      %c0_8 = arith.constant 0 : index
      %c0_9 = arith.constant 0 : index
      %14 = vector.load %arg4[%c0_8, %c0_9] : memref<16x32xf32, #tpu.memory_space<vmem>>, vector<16x32xf32>
      %c16_i32 = arith.constant 16 : i32
      %15 = arith.muli %1, %c16_i32 : i32
      %16 = tpu.iota {dimensions = array<i32: 1>} : vector<3x16xi32>
      %17 = vector.broadcast %15 : i32 to vector<3x16xi32>
      %18 = arith.addi %17, %16 : vector<3x16xi32>
      %19 = vector.broadcast %5 : vector<3x1xi32> to vector<3x16xi32>
      %20 = arith.cmpi sge, %18, %19 : vector<3x16xi32>
      %21 = vector.broadcast %7 : vector<3x1xi32> to vector<3x16xi32>
      %22 = arith.cmpi slt, %18, %21 : vector<3x16xi32>
      %23 = arith.andi %20, %22 : vector<3x16xi1>
      %24 = arith.extui %23 : vector<3x16xi1> to vector<3x16xi32>
      %25 = arith.sitofp %24 : vector<3x16xi32> to vector<3x16xf32>
      %c0_10 = arith.constant 0 : index
      %c0_11 = arith.constant 0 : index
      %c0_12 = arith.constant 0 : index
      %26 = vector.load %arg5[%c0_10, %c0_11, %c0_12] : memref<1x3x32xf32, #tpu.memory_space<vmem>>, vector<1x3x32xf32>
      %27 = vector.shape_cast %26 : vector<1x3x32xf32> to vector<3x32xf32>
      %cst = arith.constant dense<0.000000e+00> : vector<3x32xf32>
      %28 = tpu.matmul %25, %14, %cst {dimension_numbers = #tpu.dot_dimension_numbers<[1], [0], [0], [1], [0, 0, 1, 1], [], []>} : vector<3x16xf32>, vector<16x32xf32>, vector<3x32xf32> -> vector<3x32xf32>
      %29 = arith.addf %27, %28 : vector<3x32xf32>
      %c0_13 = arith.constant 0 : index
      %c0_14 = arith.constant 0 : index
      %c0_15 = arith.constant 0 : index
      %30 = vector.load %arg5[%c0_13, %c0_14, %c0_15] : memref<1x3x32xf32, #tpu.memory_space<vmem>>, vector<1x3x32xf32>
      %31 = vector.shape_cast %30 : vector<1x3x32xf32> to vector<3x32xf32>
      %32 = vector.shape_cast %29 : vector<3x32xf32> to vector<1x3x32xf32>
      tpu.vector_store %arg5[%c0_13, %c0_14, %c0_15], %32 {strides = array<i32>} : memref<1x3x32xf32, #tpu.memory_space<vmem>>, vector<1x3x32xf32>,
    } else {
    }
    %c0_i32_6 = arith.constant 0 : i32
    %11 = arith.cmpi eq, %1, %c0_i32_6 : i32
    %12 = arith.extui %11 : i1 to i32
    %c0_i32_7 = arith.constant 0 : i32
    %13 = arith.cmpi ne, %12, %c0_i32_7 : i32
    scf.if %13 {
      %c0_8 = arith.constant 0 : index
      %c0_9 = arith.constant 0 : index
      %14 = vector.load %arg4[%c0_8, %c0_9] : memref<16x32xf32, #tpu.memory_space<vmem>>, vector<16x32xf32>
      %15 = tpu.iota {dimensions = array<i32: 0>} : vector<16x1xi32>
      %c0_i32_10 = arith.constant 0 : i32
      %16 = vector.broadcast %c0_i32_10 : i32 to vector<16x1xi32>
      %17 = arith.addi %16, %15 : vector<16x1xi32>
      %c13_i32 = arith.constant 13 : i32
      %18 = vector.broadcast %c13_i32 : i32 to vector<16x1xi32>
      %19 = arith.cmpi slt, %17, %18 : vector<16x1xi32>
      %cst = arith.constant 0.000000e+00 : f32
      %20 = vector.broadcast %cst : f32 to vector<16x32xf32>
      %21 = vector.shape_cast %19 : vector<16x1xi1> to vector<16x1xi1>
      %22 = vector.broadcast %21 : vector<16x1xi1> to vector<16x32xi1>
      %23 = arith.select %22, %14, %20 : vector<16x32xi1>, vector<16x32xf32>
      %c16_i32 = arith.constant 16 : i32
      %24 = arith.muli %1, %c16_i32 : i32
      %25 = tpu.iota {dimensions = array<i32: 1>} : vector<3x16xi32>
      %26 = vector.broadcast %24 : i32 to vector<3x16xi32>
      %27 = arith.addi %26, %25 : vector<3x16xi32>
      %28 = vector.broadcast %5 : vector<3x1xi32> to vector<3x16xi32>
      %29 = arith.cmpi sge, %27, %28 : vector<3x16xi32>
      %30 = vector.broadcast %7 : vector<3x1xi32> to vector<3x16xi32>
      %31 = arith.cmpi slt, %27, %30 : vector<3x16xi32>
      %32 = arith.andi %29, %31 : vector<3x16xi1>
      %33 = arith.extui %32 : vector<3x16xi1> to vector<3x16xi32>
      %34 = arith.sitofp %33 : vector<3x16xi32> to vector<3x16xf32>
      %c0_11 = arith.constant 0 : index
      %c0_12 = arith.constant 0 : index
      %c0_13 = arith.constant 0 : index
      %35 = vector.load %arg5[%c0_11, %c0_12, %c0_13] : memref<1x3x32xf32, #tpu.memory_space<vmem>>, vector<1x3x32xf32>
      %36 = vector.shape_cast %35 : vector<1x3x32xf32> to vector<3x32xf32>
      %cst_14 = arith.constant dense<0.000000e+00> : vector<3x32xf32>
      %37 = tpu.matmul %34, %23, %cst_14 {dimension_numbers = #tpu.dot_dimension_numbers<[1], [0], [0], [1], [0, 0, 1, 1], [], []>} : vector<3x16xf32>, vector<16x32xf32>, vector<3x32xf32> -> vector<3x32xf32>
      %38 = arith.addf %36, %37 : vector<3x32xf32>
      %c0_15 = arith.constant 0 : index
      %c0_16 = arith.constant 0 : index
      %c0_17 = arith.constant 0 : index
      %39 = vector.load %arg5[%c0_15, %c0_16, %c0_17] : memref<1x3x32xf32, #tpu.memory_space<vmem>>, vector<1x3x32xf32>
      %40 = vector.shape_cast %39 : vector<1x3x32xf32> to vector<3x32xf32>
      %41 = vector.shape_cast %38 : vector<3x32xf32> to vector<1x3x32xf32>
      tpu.vector_store %arg5[%c0_15, %c0_16, %c0_17], %41 {strides = array<i32>} : memref<1x3x32xf32, #tpu.memory_space<vmem>>, vector<1x3x32xf32>,
    } else {
    }
    return
  }
  func.func @transform_0(%arg0: i32, %arg1: i32) -> (i32, i32) {
    %c0_i32 = arith.constant 0 : i32
    %c0_i32_0 = arith.constant 0 : i32
    %c0_i32_1 = arith.constant 0 : i32
    return %c0_i32, %c0_i32_0 : i32, i32
  }
  func.func @transform_1(%arg0: i32, %arg1: i32) -> (i32, i32) {
    %c0_i32 = arith.constant 0 : i32
    %c0_i32_0 = arith.constant 0 : i32
    %c0_i32_1 = arith.constant 0 : i32
    return %c0_i32, %c0_i32_0 : i32, i32
  }
  func.func @transform_2(%arg0: i32, %arg1: i32) -> (i32, i32) {
    %c1_i32 = arith.constant 1 : i32
    %0 = arith.muli %arg0, %c1_i32 : i32
    %1 = arith.addi %0, %arg1 : i32
    %c0_i32 = arith.constant 0 : i32
    %2 = arith.minsi %1, %c0_i32 : i32
    %c0_i32_0 = arith.constant 0 : i32
    %c0_i32_1 = arith.constant 0 : i32
    return %2, %c0_i32_0 : i32, i32
  }
  func.func @transform_3(%arg0: i32, %arg1: i32) -> (i32, i32, i32) {
    %c0_i32 = arith.constant 0 : i32
    %c0_i32_0 = arith.constant 0 : i32
    %c0_i32_1 = arith.constant 0 : i32
    return %arg0, %c0_i32, %c0_i32_0 : i32, i32, i32
  }
}

</mosaic_0001>

<bundles_post_ra>
// kernel: tpu_custom_call.1
= control target key start
LH: loop header
LB: loop body
LE: loop exit
PB: predicated region body
PF: predicated region fallthrough
CT: control target
= control target key end

     0   :  { %8 = vsyncpa [#allocation3], 0  ;;  %s507_s0 = inlined_call_operand.hbm [shape: s32[3,1], index: 0, kind: input, shape index: {}]   ;;  %s508_s1 = inlined_call_operand.hbm [shape: s32[3,1], index: 1, kind: input, shape index: {}]   ;;  %s509_s2 = inlined_call_operand.hbm [shape: f32[13,32], index: 2, kind: input, shape index: {}]   ;;  %s510_s3 = inlined_call_operand.hbm [shape: f32[1,3,32], index: 3, kind: output, shape index: {}]  }
   0x1   :  { %9 = vsyncpa [#allocation6], 0 }
   0x2   :  { %10 = vsyncpa [#allocation4], 0  ;;  %s426_s12 = smov [#allocation5]   ;;  %s427_s14 = smov [#allocation2]  }
   0x3   :  { %s27_s13 = sshll.u32 %s426_s12, 4  ;;  %s17_s15 = sshll.u32 %s427_s14, 4  ;;  %s28_s13 = int_to_ptr.vmem [resolvable:$true] %s27_s13  ;;  %s18_s15 = int_to_ptr.vmem [resolvable:$true] %s17_s15 }
   0x4   :  { %s332_s18 = scalar_lea.hbm %s508_s1, 64 }
   0x5   :  { %p333_p0 = scmp.ne.s32.totalorder %s508_s1, %s332_s18  ;;  %p336_p1 = scmp.lt.u32.totalorder %s332_s18, %s508_s1 }
   0x7   :  { %p338_p2 = pnand %p336_p1, %p333_p0 }
   0x9   :  { %341 = shalt.err (!%p338_p2)
}
   0xa   :  { %s342_s23 = scalar_lea.vmem %s28_s13, 64  ;;  %p347_p4 = scmp.lt.s32.totalorder %s28_s13, %s28_s13 }
   0xb   :  { %p343_p3 = scmp.ne.s32.totalorder %s28_s13, %s342_s23  ;;  %p348_p5 = scmp.lt.s32.totalorder %s342_s23, %s342_s23 }
   0xd   :  { %p349_p6 = por %p348_p5, %p347_p4 }
   0xf   :  { %p350_p7 = pnand %p349_p6, %p343_p3 }
  0x11   :  { %353 = shalt.err (!%p350_p7)
}
  0x12   :  { %30 = dma.hbm_to_vmem [thread:$0]  %s508_s1, 64, %s28_s13, [#allocation6]  }
  0x13   :  { %s354_s28 = scalar_lea.hbm %s507_s0, 64 }
  0x14   :  { %p355_p8 = scmp.ne.s32.totalorder %s507_s0, %s354_s28  ;;  %p358_p9 = scmp.lt.u32.totalorder %s354_s28, %s507_s0 }
  0x16   :  { %p360_p10 = pnand %p358_p9, %p355_p8 }
  0x18   :  { %363 = shalt.err (!%p360_p10)
}
  0x19   :  { %s364_s6 = scalar_lea.vmem %s18_s15, 64  ;;  %p369_p12 = scmp.lt.s32.totalorder %s18_s15, %s18_s15 }
  0x1a   :  { %p365_p11 = scmp.ne.s32.totalorder %s18_s15, %s364_s6  ;;  %p370_p13 = scmp.lt.s32.totalorder %s364_s6, %s364_s6 }
  0x1c   :  { %p371_p0 = por %p370_p13, %p369_p12 }
  0x1e   :  { %p372_p1 = pnand %p371_p0, %p365_p11 }
  0x20   :  { %375 = shalt.err (!%p372_p1)
}
  0x21   :  { %20 = dma.hbm_to_vmem [thread:$0]  %s507_s0, 64, %s18_s15, [#allocation3]  }
  0x22   :  { %s428_s8 = smov [#allocation7]   ;;  %s376_s12 = scalar_lea.hbm %s509_s2, 256 }
  0x23   :  { %s42_s9 = sshll.u32 %s428_s8, 4  ;;  %p377_p2 = scmp.ne.s32.totalorder %s509_s2, %s376_s12  ;;  %s43_s9 = int_to_ptr.vmem [resolvable:$true] %s42_s9 }
  0x24   :  { %p380_p3 = scmp.lt.u32.totalorder %s376_s12, %s509_s2 }
  0x26   :  { %p382_p4 = pnand %p380_p3, %p377_p2 }
  0x28   :  { %385 = shalt.err (!%p382_p4)
}
  0x29   :  { %s386_s18 = scalar_lea.vmem %s43_s9, 256  ;;  %p391_p6 = scmp.lt.s32.totalorder %s43_s9, %s43_s9 }
  0x2a   :  { %p387_p5 = scmp.ne.s32.totalorder %s43_s9, %s386_s18  ;;  %p392_p7 = scmp.lt.s32.totalorder %s386_s18, %s386_s18 }
  0x2c   :  { %p393_p8 = por %p392_p7, %p391_p6 }
  0x2e   :  { %p394_p9 = pnand %p393_p8, %p387_p5 }
  0x30   :  { %397 = shalt.err (!%p394_p9)
}
  0x31   :  { %s429_s0 = smov 128   ;;  %s430_s15 = smov 8  }
  0x32   :  { %48 = dma.hbm_to_vmem [thread:$0]  %s509_s2, 256, %s43_s9, [#allocation6], %s429_s0, %s429_s0, %s430_s15  }
  0x33   :  { %420 = dma.done.wait [#allocation3], 64  }
  0x34   :  { %421 = vsyncadd [#allocation3], 4294967232 }
  0x35   :  { %422 = dma.done.wait [#allocation6], 320  }
  0x36   :  { %423 = vsyncadd [#allocation6], 4294966976  ;;  %v431_v0 = vmov 0   ;;  %v178_v1 = vlaneseq  ;;  %v69_v3 = vld [vmem:[#allocation2] sm:$0x7]  ;;  %v432_v7 = vmov 0.0|0.0  }
  0x37   :  { %331 = vset.pattern.permute.xlu0 %v431_v0  ;;  %v70_v4 = vld [vmem:[#allocation5] sm:$0x7]  ;;  %316 = vmatprep.subr.bf16.mxu0 %v432_v7  ;;  %v176_v8 = vld [vmem:[#allocation7] sm:$0xff]  ;;  %v177_v9 = vld [vmem:[#allocation7 + $0x8] sm:$0xff]  ;;  %vm433_vm1 = vmmov 1   ;;  %vm67_vm3 = vcmask 256000  }
  0x38   :  { %v179_v2 = vshrl.u32 %v178_v1, 7  ;;  %195 = vperm.xlu0 %331, %v69_v3   ;;  %v71_v5 = vadd.s32 %v70_v4, %v69_v3  ;;  %v317_v10 = vpack.c.bf16 %v177_v9, %v176_v8  ;;  %v434_v11 = vmov 0.0   ;;  %s436_s2 = smov [#allocation8]  }
  0x39   :  { %68 = vst.msk [vmem:[#allocation8] sm:$0x7] %vm67_vm3, %v434_v11  ;;  %vm435_vm4 = vmmov 0   ;;  %v191_v13 = vand.u32 127, %v178_v1  ;;  %vm206_vm7 = vcmask 130048   ;;  %s289_s21 = sshll.u32 %s436_s2, 4  ;;  %s290_s21 = int_to_ptr.vmem [resolvable:$true] %s289_s21 }
  0x3a   :  { %v180_v6 = vadd.s32 8, %v179_v2  ;;  %313 = vmatprep.mubr.msk.f32.mxu0 %vm435_vm4, %v434_v11  ;;  %s398_s22 = scalar_lea.vmem %s290_s21, 64  ;;  %p403_p11 = scmp.lt.s32.totalorder %s290_s21, %s290_s21 }
  0x3b   :  { %p399_p10 = scmp.ne.s32.totalorder %s290_s21, %s398_s22  ;;  %p404_p12 = scmp.lt.s32.totalorder %s398_s22, %s398_s22 }
  0x3c   :  { %vm182_vm0 = vcmp.lt.s32.totalorder %v180_v6, 13  ;;  %199 = vperm.xlu0 %331, %v71_v5  }
  0x3d   :  { %vm318_vm2 = vmpackc.low %vm182_vm0, %vm433_vm1  ;;  %p405_p13 = por %p404_p12, %p403_p11 }
  0x3e   :  { %319 = vmatpush3.bf16.msk.msra.mxu0 %vm318_vm2, %v317_v10 }
  0x3f   :  { %p406_p0 = pnand %p405_p13, %p399_p10 }
  0x40   :  { %v205_v16 = vld [vmem:[#allocation8] sm:$0x7] }
  0xb7   :  { %v196_v12 = vpop.permute.xlu0 %195 }
  0xb8   :  { %vm197_vm5 = vcmp.ge.s32.totalorder %v191_v13, %v196_v12 }
  0xbb   :  { %v200_v14 = vpop.permute.xlu0 %199 }
  0xbc   :  { %vm201_vm6 = vcmp.lt.s32.totalorder %v191_v13, %v200_v14 }
  0xbd   :  { %vm202_vm8 = vmand %vm197_vm5, %vm201_vm6 }
  0xbe   :  { %v303_v15 = vsel %vm202_vm8, 1.0, %v434_v11 }
  0xbf   :  { %314 = vmatmul.mubr.msk.f32.vlgmr.msra.gmra.mrb[0].mxu0 %vm206_vm7, %v303_v15 }
 0x192   :  { %v276_v17 = vpop.f32.mrb[0].mxu0 }
 0x193   :  { %v280_v18 = vadd.f32 %v276_v17, %v205_v16  ;;  %v315_v19 = vpop.f32.mrb[1].mxu0 }
 0x195   :  { %282 = vst.msk [vmem:[#allocation8] sm:$0x7] %vm67_vm3, %v280_v18 }
 0x196   :  { %409 = shalt.err (!%p406_p0)
}
 0x197   :  { %s410_s25 = scalar_lea.hbm %s510_s3, 64 }
 0x198   :  { %p411_p1 = scmp.ne.s32.totalorder %s510_s3, %s410_s25  ;;  %p414_p2 = scmp.lt.u32.totalorder %s410_s25, %s510_s3 }
 0x19a   :  { %p416_p3 = pnand %p414_p2, %p411_p1 }
 0x19c   :  { %419 = shalt.err (!%p416_p3)
}
 0x19d   :  { %292 = dma.vmem_to_hbm [thread:$0]  %s290_s21, 64, %s510_s3, [#allocation4]  }
 0x19e   :  { %424 = dma.done.wait [#allocation4], 64  }
 0x19f   :  { %425 = vsyncadd [#allocation4], 4294967232 }
 0x1a0   :  { %296 = vsyncpa [#allocation3], 1 }
 0x1a1   :  { %297 = vsyncpa [#allocation6], 1 }
 0x1a2   :  { %298 = vsyncpa [#allocation4], 1 }

</bundles_post_ra>
